<compile_context>
chip_gen: v5e
topology: v5e:2x2
jax: 0.10.0
libtpu: 0.0.40
codegen_flags: <defaults>
</compile_context>

<pallas_src>
import functools
import math

import jax
import jax.numpy as jnp
from jax.experimental import pallas as pl
from jax.experimental.pallas import tpu as pltpu

CORRECT_PROB = 0.99
TOPK = 100      # the 19 windows [i, i+10), i = 0,5,...,90 only touch cols 0..99
KP = 128        # top-k slab padded to one full lane group
WIN = 10        # window length
NW = 19         # number of windows
NWP = 128       # window axis padded to a full lane group for the matmuls


def _round_up(x, m):
    return (x + m - 1) // m * m


def _tfkd_v9_kernel(out_ref, top_ref, label_ref, w_ref, part_ref, *,
                    n_rows, coef_label, coef_all, coef_win):
    logits = out_ref[...]                       # (TN, K)  f32 raw logits
    s_top = top_ref[...]                        # (TN, KP) f32 top-100 desc, padded
    labels = label_ref[...]                     # (TN, 1)  int32
    wsel = w_ref[...]                           # (KP, NWP) f32 0/1 window selector
    TN, K = logits.shape

    # Row max is simply the first sorted element (free vreg slice).
    m = s_top[:, 0:1]                           # (TN, 1)

    # log_softmax pieces of the full logits (one exp pass, one row reduce).
    z = jnp.exp(logits - m)
    lse = m + jnp.log(jnp.sum(z, axis=1, keepdims=True))          # (TN, 1)

    col = jax.lax.broadcasted_iota(jnp.int32, (TN, K), 1)
    onehot = col == labels
    lq_label = jnp.sum(jnp.where(onehot, logits, 0.0),
                       axis=1, keepdims=True) - lse                # (TN, 1)
    lq_rowsum = jnp.sum(logits, axis=1, keepdims=True) - K * lse   # (TN, 1)

    # Windowed sums on the MXU: exp computed once, both reductions as matmuls.
    e_top = jnp.exp(s_top - m)                                     # (TN, KP)
    e_sum = jnp.dot(e_top, wsel, preferred_element_type=jnp.float32)  # (TN, NWP)
    w_sum = jnp.dot(s_top, wsel, preferred_element_type=jnp.float32)  # (TN, NWP)

    wcol = jax.lax.broadcasted_iota(jnp.int32, (TN, NWP), 1)
    log_e = jnp.where(wcol < NW,
                      jnp.log(jnp.maximum(e_sum, 1e-30)), 0.0)
    # sum_w (10 * logsumexp(window) - sum(window)), per row
    win_row = (float(WIN * NW) * m
               + WIN * jnp.sum(log_e, axis=1, keepdims=True)
               - jnp.sum(w_sum, axis=1, keepdims=True))            # (TN, 1)

    per_row = (coef_label * lq_label
               + coef_all * lq_rowsum
               + coef_win * win_row)                               # (TN, 1)

    # Mask rows padded up to the tile boundary.
    row = (pl.program_id(0) * TN
           + jax.lax.broadcasted_iota(jnp.int32, (TN, 1), 0))
    per_row = jnp.where(row < n_rows, per_row, 0.0)

    # Lane-dense per-tile partial-sum block (all elements equal the partial).
    part_ref[...] = jnp.broadcast_to(jnp.sum(per_row), part_ref.shape)


def tfkd_v9_loss(output, label, *, model="default", alpha=0.1, block_rows=512):
    # Hyper-parameters selected exactly like TFKD_regularization.__init__.
    if model == "resnet18":
        a_tfkd, T, multiplier = 0.1, 20, 100
    elif model == "resnext":
        a_tfkd, T, multiplier = 0.5, 40, 1
    elif model == "densenet121":
        a_tfkd, T, multiplier = 0.1, 40, 1
    else:
        a_tfkd, T, multiplier = 0.1, 40, 1

    output = output.astype(jnp.float32)
    N, K = output.shape
    assert K >= TOPK, "the 19 sorted windows assume K >= 100 (as in the module)"

    # --- teacher softmax is two-valued per row -> fold to Python constants ---
    c = (1.0 - CORRECT_PROB) / (K - 1)
    t_hot, t_cold = CORRECT_PROB / T, c / T
    lse_t = t_hot + math.log1p((K - 1) * math.exp(t_cold - t_hot))
    log_p_hot, log_p_cold = t_hot - lse_t, t_cold - lse_t
    p_hot, p_cold = math.exp(log_p_hot), math.exp(log_p_cold)
    c_teacher = p_hot * log_p_hot + (K - 1) * p_cold * log_p_cold

    coef_label = -(1.0 - a_tfkd) - a_tfkd * multiplier * (p_hot - p_cold) / K
    coef_all = -a_tfkd * multiplier * p_cold / K
    coef_win = alpha * c
    const_term = a_tfkd * multiplier * c_teacher / K

    # --- batch tiling (sized well under v7x's 64 MiB VMEM for any K) ---------
    TN = min(block_rows, _round_up(N, 8))
    Npad = _round_up(N, TN)
    num_tiles = Npad // TN

    # --- XLA glue: top-100 (descending) replaces the full sort ---------------
    top_vals = jax.lax.top_k(output, TOPK)[0]                       # (N, 100)
    top_pad = jnp.pad(top_vals, ((0, Npad - N), (0, KP - TOPK)))
    out_pad = jnp.pad(output, ((0, Npad - N), (0, 0)))
    lab_pad = jnp.pad(label.astype(jnp.int32).reshape(N, 1),
                      ((0, Npad - N), (0, 0)))

    # Constant 0/1 selection matrix: W[k, w] = 1 iff k in window [5w, 5w+10).
    k_idx = jnp.arange(KP, dtype=jnp.int32)[:, None]
    w_idx = jnp.arange(NWP, dtype=jnp.int32)[None, :]
    start = 5 * w_idx
    wsel = ((w_idx < NW) & (k_idx >= start)
            & (k_idx < start + WIN)).astype(jnp.float32)            # (KP, NWP)

    kernel = functools.partial(
        _tfkd_v9_kernel, n_rows=N,
        coef_label=float(coef_label), coef_all=float(coef_all),
        coef_win=float(coef_win))

    parts = pl.pallas_call(
        kernel,
        out_shape=jax.ShapeDtypeStruct((num_tiles, 8, 128), jnp.float32),
        grid=(num_tiles,),
        in_specs=[pl.BlockSpec((TN, K), lambda t: (t, 0)),
                  pl.BlockSpec((TN, KP), lambda t: (t, 0)),
                  pl.BlockSpec((TN, 1), lambda t: (t, 0)),
                  pl.BlockSpec((KP, NWP), lambda t: (0, 0))],
        out_specs=pl.BlockSpec((1, 8, 128), lambda t: (t, 0, 0)),
        compiler_params=pltpu.CompilerParams(
            dimension_semantics=("parallel",)),
    )(out_pad, top_pad, lab_pad, wsel)

    return jnp.sum(parts[:, 0, 0]) / N + const_term


def ref_loss(output, label, *, model="default", alpha=0.1):
    """Pure-JAX reference mirroring the PyTorch module."""
    if model == "resnet18":
        a_tfkd, T, multiplier = 0.1, 20, 100
    elif model == "resnext":
        a_tfkd, T, multiplier = 0.5, 40, 1
    elif model == "densenet121":
        a_tfkd, T, multiplier = 0.1, 40, 1
    else:
        a_tfkd, T, multiplier = 0.1, 40, 1

    output = output.astype(jnp.float32)
    N, K = output.shape
    c = (1.0 - CORRECT_PROB) / (K - 1)

    log_q = jax.nn.log_softmax(output, axis=1)
    onehot = jax.nn.one_hot(label, K, dtype=jnp.float32)
    loss_ce = -jnp.mean(jnp.sum(onehot * log_q, axis=1))

    teacher = jnp.where(onehot > 0, CORRECT_PROB, c)
    p = jax.nn.softmax(teacher / T, axis=1)
    kl = jnp.mean(p * (jnp.log(p) - log_q))

    loss = (1.0 - a_tfkd) * loss_ce + a_tfkd * kl * multiplier

    sorted_desc = -jnp.sort(-output, axis=1)
    for i in range(0, 90 + 1, 5):
        sub = sorted_desc[:, i:i + 10]
        log_sub = jax.nn.log_softmax(sub, axis=1)
        sub_loss = jnp.sum(jnp.mean(-c * log_sub, axis=0))
        loss = loss + sub_loss * alpha
    return loss


if __name__ == "__main__":
    key = jax.random.PRNGKey(0)
    k1, k2 = jax.random.split(key)
    N, K = 8, 128          # K >= 100 required by the 19 sorted windows
    output = jax.random.normal(k1, (N, K), dtype=jnp.float32)
    label = jax.random.randint(k2, (N,), 0, K, dtype=jnp.int32)

    loss = tfkd_v9_loss(output, label, model="default", alpha=0.1)
    loss = jax.block_until_ready(loss)

    ref = ref_loss(output, label, model="default", alpha=0.1)
    assert jnp.allclose(loss, ref, rtol=1e-4, atol=1e-4), (float(loss), float(ref))
    print("KERNEL_OK")
</pallas_src>

<mosaic_0001>
module attributes {stable_mosaic.version = 11 : i64} {
  func.func @_tfkd_v9_kernel(%arg0: i32, %arg1: memref<8x128xf32, #tpu.memory_space<vmem>>, %arg2: memref<8x128xf32, #tpu.memory_space<vmem>>, %arg3: memref<8x1xi32, #tpu.memory_space<vmem>>, %arg4: memref<128x128xf32, #tpu.memory_space<vmem>>, %arg5: memref<1x8x128xf32, #tpu.memory_space<vmem>>) attributes {dimension_semantics = [#tpu.dimension_semantics<parallel>], iteration_bounds = array<i64: 1>, scalar_prefetch = 0 : i64, scratch_operands = 0 : i64, tpu.core_type = #tpu.core_type<tc>, window_params = [{transform_indices = @transform_0, window_bounds = array<i64: 8, 128>}, {transform_indices = @transform_1, window_bounds = array<i64: 8, 128>}, {transform_indices = @transform_2, window_bounds = array<i64: 8, 1>}, {pipeline_mode = #tpu.pipeline_mode<synchronous>, transform_indices = @transform_3, window_bounds = array<i64: 128, 128>}, {transform_indices = @transform_4, window_bounds = array<i64: 1, 8, 128>}]} {
    %c0 = arith.constant 0 : index
    %c0_0 = arith.constant 0 : index
    %0 = vector.load %arg1[%c0, %c0_0] : memref<8x128xf32, #tpu.memory_space<vmem>>, vector<8x128xf32>
    %c0_1 = arith.constant 0 : index
    %c0_2 = arith.constant 0 : index
    %1 = vector.load %arg2[%c0_1, %c0_2] : memref<8x128xf32, #tpu.memory_space<vmem>>, vector<8x128xf32>
    %c0_3 = arith.constant 0 : index
    %c0_4 = arith.constant 0 : index
    %2 = vector.load %arg3[%c0_3, %c0_4] : memref<8x1xi32, #tpu.memory_space<vmem>>, vector<8x1xi32>
    %c0_5 = arith.constant 0 : index
    %c0_6 = arith.constant 0 : index
    %3 = vector.load %arg4[%c0_5, %c0_6] : memref<128x128xf32, #tpu.memory_space<vmem>>, vector<128x128xf32>
    %4 = vector.extract_strided_slice %1 {offsets = [0, 0], sizes = [8, 1], strides = [1, 1]} : vector<8x128xf32> to vector<8x1xf32>
    %5 = vector.broadcast %4 : vector<8x1xf32> to vector<8x128xf32>
    %6 = arith.subf %0, %5 : vector<8x128xf32>
    %7 = math.exp %6 : vector<8x128xf32>
    %cst = arith.constant dense<0.000000e+00> : vector<8xf32>
    %8 = vector.multi_reduction <add>, %7, %cst [1] : vector<8x128xf32> to vector<8xf32>
    %9 = vector.shape_cast %8 : vector<8xf32> to vector<8x1xf32>
    %10 = math.log %9 : vector<8x1xf32>
    %11 = arith.addf %4, %10 : vector<8x1xf32>
    %12 = tpu.iota {dimensions = array<i32: 1>} : vector<8x128xi32>
    %13 = vector.broadcast %2 : vector<8x1xi32> to vector<8x128xi32>
    %14 = arith.cmpi eq, %12, %13 : vector<8x128xi32>
    %cst_7 = arith.constant 0.000000e+00 : f32
    %15 = vector.broadcast %cst_7 : f32 to vector<8x128xf32>
    %16 = arith.select %14, %0, %15 : vector<8x128xi1>, vector<8x128xf32>
    %cst_8 = arith.constant dense<0.000000e+00> : vector<8xf32>
    %17 = vector.multi_reduction <add>, %16, %cst_8 [1] : vector<8x128xf32> to vector<8xf32>
    %18 = vector.shape_cast %17 : vector<8xf32> to vector<8x1xf32>
    %19 = arith.subf %18, %11 : vector<8x1xf32>
    %cst_9 = arith.constant dense<0.000000e+00> : vector<8xf32>
    %20 = vector.multi_reduction <add>, %0, %cst_9 [1] : vector<8x128xf32> to vector<8xf32>
    %21 = vector.shape_cast %20 : vector<8xf32> to vector<8x1xf32>
    %cst_10 = arith.constant 1.280000e+02 : f32
    %22 = vector.broadcast %cst_10 : f32 to vector<8x1xf32>
    %23 = arith.mulf %22, %11 : vector<8x1xf32>
    %24 = arith.subf %21, %23 : vector<8x1xf32>
    %25 = vector.broadcast %4 : vector<8x1xf32> to vector<8x128xf32>
    %26 = arith.subf %1, %25 : vector<8x128xf32>
    %27 = math.exp %26 : vector<8x128xf32>
    %cst_11 = arith.constant dense<0.000000e+00> : vector<8x128xf32>
    %28 = tpu.matmul %27, %3, %cst_11 {dimension_numbers = #tpu.dot_dimension_numbers<[1], [0], [0], [1], [0, 0, 1, 1], [], []>} : vector<8x128xf32>, vector<128x128xf32>, vector<8x128xf32> -> vector<8x128xf32>
    %cst_12 = arith.constant dense<0.000000e+00> : vector<8x128xf32>
    %29 = tpu.matmul %1, %3, %cst_12 {dimension_numbers = #tpu.dot_dimension_numbers<[1], [0], [0], [1], [0, 0, 1, 1], [], []>} : vector<8x128xf32>, vector<128x128xf32>, vector<8x128xf32> -> vector<8x128xf32>
    %30 = tpu.iota {dimensions = array<i32: 1>} : vector<8x128xi32>
    %c19_i32 = arith.constant 19 : i32
    %31 = vector.broadcast %c19_i32 : i32 to vector<8x128xi32>
    %32 = arith.cmpi slt, %30, %31 : vector<8x128xi32>
    %cst_13 = arith.constant 1.000000e-30 : f32
    %33 = vector.broadcast %cst_13 : f32 to vector<8x128xf32>
    %34 = arith.maximumf %28, %33 : vector<8x128xf32>
    %35 = math.log %34 : vector<8x128xf32>
    %cst_14 = arith.constant 0.000000e+00 : f32
    %36 = vector.broadcast %cst_14 : f32 to vector<8x128xf32>
    %37 = arith.select %32, %35, %36 : vector<8x128xi1>, vector<8x128xf32>
    %cst_15 = arith.constant 1.900000e+02 : f32
    %38 = vector.broadcast %cst_15 : f32 to vector<8x1xf32>
    %39 = arith.mulf %38, %4 : vector<8x1xf32>
    %cst_16 = arith.constant dense<0.000000e+00> : vector<8xf32>
    %40 = vector.multi_reduction <add>, %37, %cst_16 [1] : vector<8x128xf32> to vector<8xf32>
    %41 = vector.shape_cast %40 : vector<8xf32> to vector<8x1xf32>
    %cst_17 = arith.constant 1.000000e+01 : f32
    %42 = vector.broadcast %cst_17 : f32 to vector<8x1xf32>
    %43 = arith.mulf %42, %41 : vector<8x1xf32>
    %44 = arith.addf %39, %43 : vector<8x1xf32>
    %cst_18 = arith.constant dense<0.000000e+00> : vector<8xf32>
    %45 = vector.multi_reduction <add>, %29, %cst_18 [1] : vector<8x128xf32> to vector<8xf32>
    %46 = vector.shape_cast %45 : vector<8xf32> to vector<8x1xf32>
    %47 = arith.subf %44, %46 : vector<8x1xf32>
    %cst_19 = arith.constant -0.900000154 : f32
    %48 = vector.broadcast %cst_19 : f32 to vector<8x1xf32>
    %49 = arith.mulf %48, %19 : vector<8x1xf32>
    %cst_20 = arith.constant -6.10232109E-6 : f32
    %50 = vector.broadcast %cst_20 : f32 to vector<8x1xf32>
    %51 = arith.mulf %50, %24 : vector<8x1xf32>
    %52 = arith.addf %49, %51 : vector<8x1xf32>
    %cst_21 = arith.constant 7.87401586E-6 : f32
    %53 = vector.broadcast %cst_21 : f32 to vector<8x1xf32>
    %54 = arith.mulf %53, %47 : vector<8x1xf32>
    %55 = arith.addf %52, %54 : vector<8x1xf32>
    %c8_i32 = arith.constant 8 : i32
    %56 = arith.muli %arg0, %c8_i32 : i32
    %57 = tpu.iota {dimensions = array<i32: 0>} : vector<8x1xi32>
    %58 = vector.broadcast %56 : i32 to vector<8x1xi32>
    %59 = arith.addi %58, %57 : vector<8x1xi32>
    %c8_i32_22 = arith.constant 8 : i32
    %60 = vector.broadcast %c8_i32_22 : i32 to vector<8x1xi32>
    %61 = arith.cmpi slt, %59, %60 : vector<8x1xi32>
    %cst_23 = arith.constant 0.000000e+00 : f32
    %62 = vector.broadcast %cst_23 : f32 to vector<8x1xf32>
    %63 = arith.select %61, %55, %62 : vector<8x1xi1>, vector<8x1xf32>
    %64 = vector.shape_cast %63 : vector<8x1xf32> to vector<1x8x1xf32>
    %cst_24 = arith.constant dense<0.000000e+00> : vector<1xf32>
    %65 = vector.multi_reduction <add>, %64, %cst_24 [1, 2] : vector<1x8x1xf32> to vector<1xf32>
    %66 = vector.shape_cast %65 : vector<1xf32> to vector<1x1x1xf32>
    %67 = vector.extract %66[0, 0, 0] : f32 from vector<1x1x1xf32>
    %68 = vector.broadcast %67 : f32 to vector<1x8x128xf32>
    %c0_25 = arith.constant 0 : index
    %c0_26 = arith.constant 0 : index
    %c0_27 = arith.constant 0 : index
    %69 = vector.load %arg5[%c0_25, %c0_26, %c0_27] : memref<1x8x128xf32, #tpu.memory_space<vmem>>, vector<1x8x128xf32>
    tpu.vector_store %arg5[%c0_25, %c0_26, %c0_27], %68 {strides = array<i32>} : memref<1x8x128xf32, #tpu.memory_space<vmem>>, vector<1x8x128xf32>,
    return
  }
  func.func @transform_0(%arg0: i32) -> (i32, i32) {
    %c0_i32 = arith.constant 0 : i32
    %c0_i32_0 = arith.constant 0 : i32
    return %arg0, %c0_i32 : i32, i32
  }
  func.func @transform_1(%arg0: i32) -> (i32, i32) {
    %c0_i32 = arith.constant 0 : i32
    %c0_i32_0 = arith.constant 0 : i32
    return %arg0, %c0_i32 : i32, i32
  }
  func.func @transform_2(%arg0: i32) -> (i32, i32) {
    %c0_i32 = arith.constant 0 : i32
    %c0_i32_0 = arith.constant 0 : i32
    return %arg0, %c0_i32 : i32, i32
  }
  func.func @transform_3(%arg0: i32) -> (i32, i32) {
    %c0_i32 = arith.constant 0 : i32
    %c0_i32_0 = arith.constant 0 : i32
    %c0_i32_1 = arith.constant 0 : i32
    return %c0_i32, %c0_i32_0 : i32, i32
  }
  func.func @transform_4(%arg0: i32) -> (i32, i32, i32) {
    %c0_i32 = arith.constant 0 : i32
    %c0_i32_0 = arith.constant 0 : i32
    %c0_i32_1 = arith.constant 0 : i32
    return %arg0, %c0_i32, %c0_i32_0 : i32, i32, i32
  }
}

</mosaic_0001>

<bundles_post_ra>
// kernel: tpu_custom_call.1
= control target key start
LH: loop header
LB: loop body
LE: loop exit
PB: predicated region body
PF: predicated region fallthrough
CT: control target
= control target key end

     0   :  { %9 = vsyncpa [#allocation3], 0  ;;  %s341_s0 = inlined_call_operand.vmem [shape: f32[8,128], index: 0, kind: input, shape index: {}]   ;;  %s342_s1 = inlined_call_operand.hbm [shape: f32[8,128], index: 1, kind: input, shape index: {}]   ;;  %s343_s2 = inlined_call_operand.vmem [shape: s32[8,1], index: 2, kind: input, shape index: {}]   ;;  %s344_s3 = inlined_call_operand.hbm [shape: f32[128,128], index: 3, kind: input, shape index: {}]   ;;  %s345_s4 = inlined_call_operand.hbm [shape: f32[1,8,128], index: 4, kind: output, shape index: {}]  }
   0x1   :  { %10 = vsyncpa [#allocation6], 0 }
   0x2   :  { %11 = vsyncpa [#allocation4], 0  ;;  %s19_s17 = sshll.u32 %s342_s1, 4  ;;  %s288_s18 = smov [#allocation2]   ;;  %s20_s17 = int_to_ptr.hbm [resolvable:$true] %s19_s17 }
   0x3   :  { %s21_s19 = sshll.u32 %s288_s18, 4  ;;  %s31_s22 = sshll.u32 %s344_s3, 4  ;;  %s22_s19 = int_to_ptr.vmem [resolvable:$true] %s21_s19  ;;  %s32_s22 = int_to_ptr.hbm [resolvable:$true] %s31_s22 }
   0x4   :  { %24 = dma.hbm_to_vmem [thread:$0]  %s20_s17, 128, %s22_s19, [#allocation3]  }
   0x5   :  { %s289_s23 = smov [#allocation5]   ;;  %s290_s25 = smov 128  }
   0x6   :  { %s33_s24 = sshll.u32 %s289_s23, 4  ;;  %s291_s26 = smov 8   ;;  %s34_s24 = int_to_ptr.vmem [resolvable:$true] %s33_s24 }
   0x7   :  { %39 = dma.hbm_to_vmem [thread:$0]  %s32_s22, 2048, %s34_s24, [#allocation6], %s290_s25, %s290_s25, %s291_s26  }
   0x8   :  { %282 = dma.done.wait [#allocation3], 128  }
   0x9   :  { %283 = vsyncadd [#allocation3], 4294967168 }
   0xa   :  { %284 = dma.done.wait [#allocation6], 2048  }
   0xb   :  { %285 = vsyncadd [#allocation6], 4294965248  ;;  %v292_v0 = vmov 0   ;;  %v325_v1 = vld [vmem:[#allocation2] sm:$0xff]  ;;  %v65_v3 = vld [vmem:[#allocation5 + $0x70] sm:$0xff]  ;;  %v80_v23 = vlaneseq  ;;  %vm162_vm2 = vcmask 7168  }
   0xc   :  { %201 = vset.pattern.permute.xlu0 %v292_v0  ;;  %v66_v2 = vld [vmem:[#allocation5 + $0x78] sm:$0xff]  ;;  %v64_v4 = vld [vmem:[#allocation5 + $0x68] sm:$0xff]  ;;  %v63_v5 = vld [vmem:[#allocation5 + $0x60] sm:$0xff]  ;;  %v142_v45 = vmul.f32 190.0, %v325_v1  ;;  %s182_s5 = sshll.u32 %s345_s4, 4  ;;  %s183_s5 = int_to_ptr.hbm [resolvable:$true] %s182_s5 }
   0xd   :  { %69 = vperm.xlu0 %201, %v325_v1   ;;  %97 = vmatpush.msra.mxu0 %v66_v2  ;;  %v50_v6 = vld [vmem:[%s343_s2] sm:$0xff]  ;;  %v61_v8 = vld [vmem:[#allocation5 + $0x50] sm:$0xff]  ;;  %v60_v9 = vld [vmem:[#allocation5 + $0x48] sm:$0xff]  ;;  %v81_v26 = vand.u32 127, %v80_v23 }
   0xe   :  { %117 = vmatpush.msra.mxu1 %v66_v2  ;;  %v62_v7 = vld [vmem:[#allocation5 + $0x58] sm:$0xff]  ;;  %v59_v10 = vld [vmem:[#allocation5 + $0x40] sm:$0xff]  ;;  %v57_v12 = vld [vmem:[#allocation5 + $0x30] sm:$0xff] }
   0xf   :  { %98 = vmatpush.msra.mxu0 %v65_v3  ;;  %v58_v11 = vld [vmem:[#allocation5 + $0x38] sm:$0xff]  ;;  %v56_v13 = vld [vmem:[#allocation5 + $0x28] sm:$0xff]  ;;  %v55_v14 = vld [vmem:[#allocation5 + $0x20] sm:$0xff]  ;;  %vm137_vm1 = vcmp.lt.s32.totalorder %v81_v26, 19 }
  0x10   :  { %118 = vmatpush.msra.mxu1 %v65_v3  ;;  %v54_v15 = vld [vmem:[#allocation5 + $0x18] sm:$0xff]  ;;  %v53_v16 = vld [vmem:[#allocation5 + $0x10] sm:$0xff]  ;;  %v52_v17 = vld [vmem:[#allocation5 + $0x8] sm:$0xff] }
  0x11   :  { %99 = vmatpush.msra.mxu0 %v64_v4  ;;  %v51_v18 = vld [vmem:[#allocation5] sm:$0xff]  ;;  %v48_v19 = vld [vmem:[%s341_s0] sm:$0xff]  ;;  %s293_s0 = smov [#allocation7]  }
  0x12   :  { %119 = vmatpush.msra.mxu1 %v64_v4  ;;  %s180_s28 = sshll.u32 %s293_s0, 4  ;;  %s181_s28 = int_to_ptr.vmem [resolvable:$true] %s180_s28 }
  0x13   :  { %100 = vmatpush.msra.mxu0 %v63_v5 }
  0x14   :  { %120 = vmatpush.msra.mxu1 %v63_v5 }
  0x15   :  { %83 = vperm.xlu0 %201, %v50_v6   ;;  %101 = vmatpush.msra.mxu0 %v62_v7 }
  0x16   :  { %121 = vmatpush.msra.mxu1 %v62_v7 }
  0x17   :  { %102 = vmatpush.msra.mxu0 %v61_v8 }
  0x18   :  { %122 = vmatpush.msra.mxu1 %v61_v8 }
  0x19   :  { %103 = vmatpush.msra.mxu0 %v60_v9 }
  0x1a   :  { %123 = vmatpush.msra.mxu1 %v60_v9 }
  0x1b   :  { %104 = vmatpush.msra.mxu0 %v59_v10 }
  0x1c   :  { %124 = vmatpush.msra.mxu1 %v59_v10 }
  0x1d   :  { %105 = vmatpush.msra.mxu0 %v58_v11 }
  0x1e   :  { %125 = vmatpush.msra.mxu1 %v58_v11 }
  0x1f   :  { %106 = vmatpush.msra.mxu0 %v57_v12 }
  0x20   :  { %126 = vmatpush.msra.mxu1 %v57_v12 }
  0x21   :  { %107 = vmatpush.msra.mxu0 %v56_v13 }
  0x22   :  { %127 = vmatpush.msra.mxu1 %v56_v13 }
  0x23   :  { %108 = vmatpush.msra.mxu0 %v55_v14 }
  0x24   :  { %128 = vmatpush.msra.mxu1 %v55_v14 }
  0x25   :  { %109 = vmatpush.msra.mxu0 %v54_v15 }
  0x26   :  { %129 = vmatpush.msra.mxu1 %v54_v15 }
  0x27   :  { %110 = vmatpush.msra.mxu0 %v53_v16 }
  0x28   :  { %130 = vmatpush.msra.mxu1 %v53_v16 }
  0x29   :  { %111 = vmatpush.msra.mxu0 %v52_v17 }
  0x2a   :  { %131 = vmatpush.msra.mxu1 %v52_v17 }
  0x2b   :  { %112 = vmatpush.msra.mxu0 %v51_v18 }
  0x2c   :  { %132 = vmatpush.msra.mxu1 %v51_v18 }
  0x2d   :  { %133 = vmatmul.f32.vlgmr.msra.gmra.mxu1 %v325_v1 }
  0x7f   :  { %v70_v20 = vpop.permute.xlu0 %69 }
  0x80   :  { %v72_v21 = vsub.f32 %v48_v19, %v70_v20  ;;  %v94_v22 = vsub.f32 %v325_v1, %v70_v20 }
  0x82   :  { %v95_v24 = vmul.f32 1.442695, %v94_v22  ;;  %v73_v25 = vmul.f32 1.442695, %v72_v21 }
  0x84   :  { %202 = vpow2.f32 %v95_v24 }
  0x85   :  { %204 = vpow2.f32 %v73_v25 }
  0x87   :  { %v84_v27 = vpop.permute.xlu0 %83 }
  0x88   :  { %vm85_vm0 = vcmp.eq.s32.totalorder %v81_v26, %v84_v27 }
  0x89   :  { %v86_v28 = vsel %vm85_vm0, %v48_v19, 0.0 }
  0x8a   :  { %v203_v29 = vpop.eup %202  ;;  %87 = vadd.xlane.f32.xlu2 %v86_v28 }
  0x8b   :  { %v205_v30 = vpop.eup %204  ;;  %113 = vmatmul.f32.vlgmr.msra.gmra.mxu0 %v203_v29 }
  0x8c   :  { %75 = vadd.xlane.f32.xlu1 %v205_v30 }
  0x92   :  { %90 = vadd.xlane.f32.xlu2 %v48_v19 }
  0xaa   :  { %v134_v31 = vpop.f32.mrf.mxu1 }
  0xab   :  { %147 = vadd.xlane.f32.xlu0 %v134_v31 }
  0xfd   :  { %v88_v40 = vpop.xlane.xlu2 %87 }
  0xff   :  { %v76_v37 = vpop.xlane.xlu1 %75 }
 0x105   :  { %v91_v43 = vpop.xlane.xlu2 %90 }
 0x108   :  { %v114_v32 = vpop.f32.mrf.mxu0 }
 0x109   :  { %v138_v33 = vmax.f32 %v114_v32, 1e-30 }
 0x10b   :  { %206 = vlog2.f32 %v138_v33 }
 0x10c   :  { %208 = vlog2.f32 %v76_v37 }
 0x111   :  { %v207_v34 = vpop.eup %206 }
 0x112   :  { %v140_v35 = vmul.f32 0.6931472, %v207_v34  ;;  %v209_v38 = vpop.eup %208 }
 0x113   :  { %v78_v39 = vmul.f32 0.6931472, %v209_v38 }
 0x114   :  { %v141_v36 = vsel %vm137_vm1, %v140_v35, 0.0 }
 0x115   :  { %143 = vadd.xlane.f32.xlu1 %v141_v36  ;;  %v79_v41 = vadd.f32 %v78_v39, %v325_v1 }
 0x117   :  { %v92_v42 = vmul.f32 128.0, %v79_v41  ;;  %v89_v47 = vsub.f32 %v88_v40, %v79_v41 }
 0x119   :  { %v93_v44 = vsub.f32 %v91_v43, %v92_v42  ;;  %v150_v52 = vmul.f32 -0.90000015, %v89_v47 }
 0x11b   :  { %v151_v50 = vmul.f32 -6.102321e-06, %v93_v44 }
 0x11d   :  { %v152_v54 = vadd.f32 %v151_v50, %v150_v52 }
 0x11e   :  { %v148_v49 = vpop.xlane.xlu0 %147 }
 0x188   :  { %v144_v46 = vpop.xlane.xlu1 %143 }
 0x189   :  { %v145_v48 = vmul.f32 10.0, %v144_v46 }
 0x18b   :  { %v146_v51 = vadd.f32 %v145_v48, %v142_v45 }
 0x18d   :  { %v149_v53 = vsub.f32 %v146_v51, %v148_v49 }
 0x18f   :  { %v153_v55 = vmul.f32 7.874016e-06, %v149_v53 }
 0x191   :  { %v154_v56 = vadd.f32 %v153_v55, %v152_v54 }
 0x193   :  { %v163_v57 = vsel %vm162_vm2, %v154_v56, 0.0 }
 0x194   :  { %164 = vadd.xlane.f32.xlu1 %v163_v57 }
 0x207   :  { %v165_v58 = vpop.xlane.xlu1 %164 }
 0x208   :  { %v166_v59 = vrot.slane %v165_v58, 4 }
 0x20a   :  { %v167_v60 = vadd.f32 %v166_v59, %v165_v58 }
 0x20c   :  { %v168_v61 = vrot.slane %v167_v60, 2 }
 0x20e   :  { %v169_v62 = vadd.f32 %v168_v61, %v167_v60 }
 0x210   :  { %v170_v63 = vrot.slane %v169_v62, 1 }
 0x212   :  { %v171_v0 = vadd.f32 %v170_v63, %v169_v62 }
 0x214   :  { %193 = vpush %v171_v0 }
 0x245   :  { %s194_s6 = spop %193 }
 0x246   :  { %v173_v1 = vstv %s194_s6 }
 0x247   :  { %174 = vst [vmem:[#allocation7] sm:$0xff] %v173_v1 }
 0x248   :  { %185 = dma.vmem_to_hbm [thread:$0]  %s181_s28, 128, %s183_s5, [#allocation4]  }
 0x249   :  { %286 = dma.done.wait [#allocation4], 128  }
 0x24a   :  { %287 = vsyncadd [#allocation4], 4294967168 }
 0x24b   :  { %190 = vsyncpa [#allocation3], 1 }
 0x24c   :  { %191 = vsyncpa [#allocation6], 1 }
 0x24d   :  { %192 = vsyncpa [#allocation4], 1 }

</bundles_post_ra>
